<compile_context>
chip_gen: v7x
topology: tpu7x:2x2x1
jax: 0.10.0
libtpu: 0.0.40
codegen_flags: <defaults>
</compile_context>

<pallas_src>
import math

import jax
import jax.numpy as jnp
from jax.experimental import pallas as pl
from jax.experimental.pallas import tpu as pltpu


LANE = 128


def _round_up(v, m):
    return (v + m - 1) // m * m


# ----------------------------------------------------------------------------
# Kernel
# ----------------------------------------------------------------------------
def _make_vae_kernel(n_enc: int, n_dec: int):
    """n_enc encoder Linear+ReLU layers, fc_mu/fc_sigma, n_dec decoder layers
    (n_dec-1 Linear+ReLU + final Linear+Sigmoid).  All layer widths padded to a
    common Ppad, weights packed as one (n_mats, Ppad, Ppad) slab."""

    def kernel(x_ref, eps_ref, w_ref, b_ref, recon_ref, mu_ref, sigma_ref):
        b_all = b_ref[...]                      # (n_mats, Ppad), tiny, resident

        # ----- encoder: Linear + ReLU stack -----
        h = x_ref[...]                          # (TILE_B, Ppad)
        li = 0
        for _ in range(n_enc):
            h = jnp.dot(h, w_ref[li], preferred_element_type=jnp.float32) + b_all[li]
            h = jnp.maximum(h, 0.0)
            li += 1

        # ----- mu / sigma heads (adjacent slab entries, full-width matmuls) ---
        mu = jnp.dot(h, w_ref[li], preferred_element_type=jnp.float32) + b_all[li]
        li += 1
        sigma = jnp.dot(h, w_ref[li], preferred_element_type=jnp.float32) + b_all[li]
        li += 1

        # ----- reparameterize: z = eps * exp(0.5 * sigma) + mu -----
        z = eps_ref[...] * jnp.exp(sigma * 0.5) + mu

        # ----- decoder: Linear + ReLU stack, final Linear + Sigmoid -----
        h = z
        for d in range(n_dec):
            h = jnp.dot(h, w_ref[li], preferred_element_type=jnp.float32) + b_all[li]
            h = jnp.maximum(h, 0.0) if d < n_dec - 1 else jax.nn.sigmoid(h)
            li += 1

        recon_ref[...] = h                      # lane-dense (TILE_B, Ppad) stores
        mu_ref[...] = mu
        sigma_ref[...] = sigma

    return kernel


# ----------------------------------------------------------------------------
# Parameter init (deterministic; mirrors nn.Linear default U(-1/sqrt(in), +))
# ----------------------------------------------------------------------------
def _init_linear(key, in_dim, out_dim):
    kw, kb = jax.random.split(key)
    bound = 1.0 / math.sqrt(in_dim)
    # stored already transposed: (in_dim, out_dim); bias (out_dim,)
    w = jax.random.uniform(kw, (in_dim, out_dim), jnp.float32, -bound, bound)
    b = jax.random.uniform(kb, (out_dim,), jnp.float32, -bound, bound)
    return w, b


def init_vae_params(key, latent_dims, point_count, hidden_dims):
    params = {"enc": [], "dec": []}
    in_dim = point_count * 2
    for h_dim in hidden_dims:
        key, k = jax.random.split(key)
        params["enc"].append(_init_linear(k, in_dim, h_dim))
        in_dim = h_dim
    key, k = jax.random.split(key)
    params["mu"] = _init_linear(k, hidden_dims[-1], latent_dims)
    key, k = jax.random.split(key)
    params["sigma"] = _init_linear(k, hidden_dims[-1], latent_dims)

    rev = hidden_dims[::-1]
    in_dim = latent_dims
    for h_dim in rev:
        key, k = jax.random.split(key)
        params["dec"].append(_init_linear(k, in_dim, h_dim))
        in_dim = h_dim
    key, k = jax.random.split(key)
    params["dec"].append(_init_linear(k, rev[-1], point_count * 2))
    return params


# ----------------------------------------------------------------------------
# Pack all layers into one padded weight slab + one bias slab
# ----------------------------------------------------------------------------
def pack_params(params, latent_dims, point_count, hidden_dims):
    dims = [point_count * 2, latent_dims] + list(hidden_dims)
    p_pad = _round_up(max(dims), LANE)

    mats = list(params["enc"]) + [params["mu"], params["sigma"]] + list(params["dec"])
    n_mats = len(mats)
    w_slab = jnp.zeros((n_mats, p_pad, p_pad), jnp.float32)
    b_slab = jnp.zeros((n_mats, p_pad), jnp.float32)
    for i, (w, b) in enumerate(mats):
        w_slab = w_slab.at[i, : w.shape[0], : w.shape[1]].set(w)
        b_slab = b_slab.at[i, : b.shape[0]].set(b)
    return w_slab, b_slab, p_pad


# ----------------------------------------------------------------------------
# Wrapper
# ----------------------------------------------------------------------------
def vae_forward(x, params, eps, latent_dims, point_count, hidden_dims, tile_b=None):
    """x: (B, point_count, 2) f32, eps: (B, latent_dims) f32.
    Returns (recon (B, point_count, 2), mu (B, L), sigma (B, L))."""
    B = x.shape[0]
    in_dim = point_count * 2
    x_flat = x.reshape(B, in_dim)                       # torch.flatten(x, 1)

    w_slab, b_slab, p_pad = pack_params(params, latent_dims, point_count, hidden_dims)
    n_mats = w_slab.shape[0]

    # batch tiling: pad B to a multiple of tile_b (>= 8 sublanes)
    if tile_b is None:
        tile_b = min(512, _round_up(B, 8))
    tile_b = max(8, _round_up(tile_b, 8))
    padded_b = _round_up(B, tile_b)
    num_tiles = padded_b // tile_b

    x_pad = jnp.zeros((padded_b, p_pad), jnp.float32).at[:B, :in_dim].set(x_flat)
    eps_pad = jnp.zeros((padded_b, p_pad), jnp.float32).at[:B, :latent_dims].set(eps)

    act_spec = pl.BlockSpec((tile_b, p_pad), lambda i: (i, 0))
    w_spec = pl.BlockSpec((n_mats, p_pad, p_pad), lambda i: (0, 0, 0))   # resident
    b_spec = pl.BlockSpec((n_mats, p_pad), lambda i: (0, 0))             # resident

    out_shape = tuple(
        jax.ShapeDtypeStruct((padded_b, p_pad), jnp.float32) for _ in range(3)
    )

    kernel = _make_vae_kernel(len(hidden_dims), len(hidden_dims) + 1)
    recon_pad, mu_pad, sigma_pad = pl.pallas_call(
        kernel,
        grid=(num_tiles,),
        in_specs=[act_spec, act_spec, w_spec, b_spec],
        out_specs=(act_spec, act_spec, act_spec),
        out_shape=out_shape,
        compiler_params=pltpu.CompilerParams(
            dimension_semantics=("parallel",),
        ),
    )(x_pad, eps_pad, w_slab, b_slab)

    recon = recon_pad[:B, :in_dim].reshape(-1, point_count, 2)
    mu = mu_pad[:B, :latent_dims]
    sigma = sigma_pad[:B, :latent_dims]
    return recon, mu, sigma


# ----------------------------------------------------------------------------
# Pure-JAX reference (sanity check)
# ----------------------------------------------------------------------------
def vae_forward_ref(x, params, eps, latent_dims, point_count):
    B = x.shape[0]
    h = x.reshape(B, point_count * 2)
    for (w, b) in params["enc"]:
        h = jnp.maximum(h @ w + b, 0.0)
    mu = h @ params["mu"][0] + params["mu"][1]
    sigma = h @ params["sigma"][0] + params["sigma"][1]
    z = eps * jnp.exp(sigma * 0.5) + mu
    h = z
    n_dec = len(params["dec"])
    for li, (w, b) in enumerate(params["dec"]):
        h = h @ w + b
        h = jnp.maximum(h, 0.0) if li < n_dec - 1 else jax.nn.sigmoid(h)
    return h.reshape(-1, point_count, 2), mu, sigma


# ----------------------------------------------------------------------------
# Main
# ----------------------------------------------------------------------------
if __name__ == "__main__":
    latent_dims = 4
    point_count = 8
    hidden_dims = [32, 16]
    B = 4

    key = jax.random.PRNGKey(0)
    k_params, k_x, k_eps = jax.random.split(key, 3)

    params = init_vae_params(k_params, latent_dims, point_count, hidden_dims)
    x = jax.random.normal(k_x, (B, point_count, 2), jnp.float32)
    # torch.randn_like(std) equivalent, drawn once so kernel & reference match
    eps = jax.random.normal(k_eps, (B, latent_dims), jnp.float32)

    recon, mu, sigma = vae_forward(
        x, params, eps, latent_dims, point_count, hidden_dims)
    jax.block_until_ready((recon, mu, sigma))

    recon_r, mu_r, sigma_r = vae_forward_ref(
        x, params, eps, latent_dims, point_count)

    assert recon.shape == (B, point_count, 2)
    assert mu.shape == (B, latent_dims) and sigma.shape == (B, latent_dims)
    assert jnp.allclose(recon, recon_r, atol=1e-5)
    assert jnp.allclose(mu, mu_r, atol=1e-5)
    assert jnp.allclose(sigma, sigma_r, atol=1e-5)

    print("KERNEL_OK")
</pallas_src>

<mosaic_0001>
module attributes {stable_mosaic.version = 11 : i64} {
  func.func @kernel(%arg0: i32, %arg1: memref<8x128xf32, #tpu.memory_space<vmem>>, %arg2: memref<8x128xf32, #tpu.memory_space<vmem>>, %arg3: memref<7x128x128xf32, #tpu.memory_space<vmem>>, %arg4: memref<7x128xf32, #tpu.memory_space<vmem>>, %arg5: memref<8x128xf32, #tpu.memory_space<vmem>>, %arg6: memref<8x128xf32, #tpu.memory_space<vmem>>, %arg7: memref<8x128xf32, #tpu.memory_space<vmem>>) attributes {dimension_semantics = [#tpu.dimension_semantics<parallel>], iteration_bounds = array<i64: 1>, scalar_prefetch = 0 : i64, scratch_operands = 0 : i64, tpu.core_type = #tpu.core_type<tc>, window_params = [{transform_indices = @transform_0, window_bounds = array<i64: 8, 128>}, {transform_indices = @transform_1, window_bounds = array<i64: 8, 128>}, {pipeline_mode = #tpu.pipeline_mode<synchronous>, transform_indices = @transform_2, window_bounds = array<i64: 7, 128, 128>}, {pipeline_mode = #tpu.pipeline_mode<synchronous>, transform_indices = @transform_3, window_bounds = array<i64: 7, 128>}, {transform_indices = @transform_4, window_bounds = array<i64: 8, 128>}, {transform_indices = @transform_5, window_bounds = array<i64: 8, 128>}, {transform_indices = @transform_6, window_bounds = array<i64: 8, 128>}]} {
    %c0 = arith.constant 0 : index
    %c0_0 = arith.constant 0 : index
    %0 = vector.load %arg4[%c0, %c0_0] : memref<7x128xf32, #tpu.memory_space<vmem>>, vector<7x128xf32>
    %c0_1 = arith.constant 0 : index
    %c0_2 = arith.constant 0 : index
    %1 = vector.load %arg1[%c0_1, %c0_2] : memref<8x128xf32, #tpu.memory_space<vmem>>, vector<8x128xf32>
    %c0_3 = arith.constant 0 : index
    %c0_4 = arith.constant 0 : index
    %c0_5 = arith.constant 0 : index
    %2 = vector.load %arg3[%c0_3, %c0_4, %c0_5] : memref<7x128x128xf32, #tpu.memory_space<vmem>>, vector<1x128x128xf32>
    %3 = vector.shape_cast %2 : vector<1x128x128xf32> to vector<128x128xf32>
    %cst = arith.constant dense<0.000000e+00> : vector<8x128xf32>
    %4 = tpu.matmul %1, %3, %cst {dimension_numbers = #tpu.dot_dimension_numbers<[1], [0], [0], [1], [0, 0, 1, 1], [], []>} : vector<8x128xf32>, vector<128x128xf32>, vector<8x128xf32> -> vector<8x128xf32>
    %5 = vector.extract_strided_slice %0 {offsets = [0, 0], sizes = [1, 128], strides = [1, 1]} : vector<7x128xf32> to vector<1x128xf32>
    %6 = vector.shape_cast %5 : vector<1x128xf32> to vector<128xf32>
    %7 = vector.shape_cast %6 : vector<128xf32> to vector<1x128xf32>
    %8 = vector.broadcast %7 : vector<1x128xf32> to vector<8x128xf32>
    %9 = arith.addf %4, %8 : vector<8x128xf32>
    %cst_6 = arith.constant 0.000000e+00 : f32
    %10 = vector.broadcast %cst_6 : f32 to vector<8x128xf32>
    %11 = arith.maximumf %9, %10 : vector<8x128xf32>
    %c1 = arith.constant 1 : index
    %c0_7 = arith.constant 0 : index
    %c0_8 = arith.constant 0 : index
    %12 = vector.load %arg3[%c1, %c0_7, %c0_8] : memref<7x128x128xf32, #tpu.memory_space<vmem>>, vector<1x128x128xf32>
    %13 = vector.shape_cast %12 : vector<1x128x128xf32> to vector<128x128xf32>
    %cst_9 = arith.constant dense<0.000000e+00> : vector<8x128xf32>
    %14 = tpu.matmul %11, %13, %cst_9 {dimension_numbers = #tpu.dot_dimension_numbers<[1], [0], [0], [1], [0, 0, 1, 1], [], []>} : vector<8x128xf32>, vector<128x128xf32>, vector<8x128xf32> -> vector<8x128xf32>
    %15 = vector.extract_strided_slice %0 {offsets = [1, 0], sizes = [1, 128], strides = [1, 1]} : vector<7x128xf32> to vector<1x128xf32>
    %16 = vector.shape_cast %15 : vector<1x128xf32> to vector<128xf32>
    %17 = vector.shape_cast %16 : vector<128xf32> to vector<1x128xf32>
    %18 = vector.broadcast %17 : vector<1x128xf32> to vector<8x128xf32>
    %19 = arith.addf %14, %18 : vector<8x128xf32>
    %cst_10 = arith.constant 0.000000e+00 : f32
    %20 = vector.broadcast %cst_10 : f32 to vector<8x128xf32>
    %21 = arith.maximumf %19, %20 : vector<8x128xf32>
    %c2 = arith.constant 2 : index
    %c0_11 = arith.constant 0 : index
    %c0_12 = arith.constant 0 : index
    %22 = vector.load %arg3[%c2, %c0_11, %c0_12] : memref<7x128x128xf32, #tpu.memory_space<vmem>>, vector<1x128x128xf32>
    %23 = vector.shape_cast %22 : vector<1x128x128xf32> to vector<128x128xf32>
    %cst_13 = arith.constant dense<0.000000e+00> : vector<8x128xf32>
    %24 = tpu.matmul %21, %23, %cst_13 {dimension_numbers = #tpu.dot_dimension_numbers<[1], [0], [0], [1], [0, 0, 1, 1], [], []>} : vector<8x128xf32>, vector<128x128xf32>, vector<8x128xf32> -> vector<8x128xf32>
    %25 = vector.extract_strided_slice %0 {offsets = [2, 0], sizes = [1, 128], strides = [1, 1]} : vector<7x128xf32> to vector<1x128xf32>
    %26 = vector.shape_cast %25 : vector<1x128xf32> to vector<128xf32>
    %27 = vector.shape_cast %26 : vector<128xf32> to vector<1x128xf32>
    %28 = vector.broadcast %27 : vector<1x128xf32> to vector<8x128xf32>
    %29 = arith.addf %24, %28 : vector<8x128xf32>
    %c3 = arith.constant 3 : index
    %c0_14 = arith.constant 0 : index
    %c0_15 = arith.constant 0 : index
    %30 = vector.load %arg3[%c3, %c0_14, %c0_15] : memref<7x128x128xf32, #tpu.memory_space<vmem>>, vector<1x128x128xf32>
    %31 = vector.shape_cast %30 : vector<1x128x128xf32> to vector<128x128xf32>
    %cst_16 = arith.constant dense<0.000000e+00> : vector<8x128xf32>
    %32 = tpu.matmul %21, %31, %cst_16 {dimension_numbers = #tpu.dot_dimension_numbers<[1], [0], [0], [1], [0, 0, 1, 1], [], []>} : vector<8x128xf32>, vector<128x128xf32>, vector<8x128xf32> -> vector<8x128xf32>
    %33 = vector.extract_strided_slice %0 {offsets = [3, 0], sizes = [1, 128], strides = [1, 1]} : vector<7x128xf32> to vector<1x128xf32>
    %34 = vector.shape_cast %33 : vector<1x128xf32> to vector<128xf32>
    %35 = vector.shape_cast %34 : vector<128xf32> to vector<1x128xf32>
    %36 = vector.broadcast %35 : vector<1x128xf32> to vector<8x128xf32>
    %37 = arith.addf %32, %36 : vector<8x128xf32>
    %c0_17 = arith.constant 0 : index
    %c0_18 = arith.constant 0 : index
    %38 = vector.load %arg2[%c0_17, %c0_18] : memref<8x128xf32, #tpu.memory_space<vmem>>, vector<8x128xf32>
    %cst_19 = arith.constant 5.000000e-01 : f32
    %39 = vector.broadcast %cst_19 : f32 to vector<8x128xf32>
    %40 = arith.mulf %37, %39 : vector<8x128xf32>
    %41 = math.exp %40 : vector<8x128xf32>
    %42 = arith.mulf %38, %41 : vector<8x128xf32>
    %43 = arith.addf %42, %29 : vector<8x128xf32>
    %c4 = arith.constant 4 : index
    %c0_20 = arith.constant 0 : index
    %c0_21 = arith.constant 0 : index
    %44 = vector.load %arg3[%c4, %c0_20, %c0_21] : memref<7x128x128xf32, #tpu.memory_space<vmem>>, vector<1x128x128xf32>
    %45 = vector.shape_cast %44 : vector<1x128x128xf32> to vector<128x128xf32>
    %cst_22 = arith.constant dense<0.000000e+00> : vector<8x128xf32>
    %46 = tpu.matmul %43, %45, %cst_22 {dimension_numbers = #tpu.dot_dimension_numbers<[1], [0], [0], [1], [0, 0, 1, 1], [], []>} : vector<8x128xf32>, vector<128x128xf32>, vector<8x128xf32> -> vector<8x128xf32>
    %47 = vector.extract_strided_slice %0 {offsets = [4, 0], sizes = [1, 128], strides = [1, 1]} : vector<7x128xf32> to vector<1x128xf32>
    %48 = vector.shape_cast %47 : vector<1x128xf32> to vector<128xf32>
    %49 = vector.shape_cast %48 : vector<128xf32> to vector<1x128xf32>
    %50 = vector.broadcast %49 : vector<1x128xf32> to vector<8x128xf32>
    %51 = arith.addf %46, %50 : vector<8x128xf32>
    %cst_23 = arith.constant 0.000000e+00 : f32
    %52 = vector.broadcast %cst_23 : f32 to vector<8x128xf32>
    %53 = arith.maximumf %51, %52 : vector<8x128xf32>
    %c5 = arith.constant 5 : index
    %c0_24 = arith.constant 0 : index
    %c0_25 = arith.constant 0 : index
    %54 = vector.load %arg3[%c5, %c0_24, %c0_25] : memref<7x128x128xf32, #tpu.memory_space<vmem>>, vector<1x128x128xf32>
    %55 = vector.shape_cast %54 : vector<1x128x128xf32> to vector<128x128xf32>
    %cst_26 = arith.constant dense<0.000000e+00> : vector<8x128xf32>
    %56 = tpu.matmul %53, %55, %cst_26 {dimension_numbers = #tpu.dot_dimension_numbers<[1], [0], [0], [1], [0, 0, 1, 1], [], []>} : vector<8x128xf32>, vector<128x128xf32>, vector<8x128xf32> -> vector<8x128xf32>
    %57 = vector.extract_strided_slice %0 {offsets = [5, 0], sizes = [1, 128], strides = [1, 1]} : vector<7x128xf32> to vector<1x128xf32>
    %58 = vector.shape_cast %57 : vector<1x128xf32> to vector<128xf32>
    %59 = vector.shape_cast %58 : vector<128xf32> to vector<1x128xf32>
    %60 = vector.broadcast %59 : vector<1x128xf32> to vector<8x128xf32>
    %61 = arith.addf %56, %60 : vector<8x128xf32>
    %cst_27 = arith.constant 0.000000e+00 : f32
    %62 = vector.broadcast %cst_27 : f32 to vector<8x128xf32>
    %63 = arith.maximumf %61, %62 : vector<8x128xf32>
    %c6 = arith.constant 6 : index
    %c0_28 = arith.constant 0 : index
    %c0_29 = arith.constant 0 : index
    %64 = vector.load %arg3[%c6, %c0_28, %c0_29] : memref<7x128x128xf32, #tpu.memory_space<vmem>>, vector<1x128x128xf32>
    %65 = vector.shape_cast %64 : vector<1x128x128xf32> to vector<128x128xf32>
    %cst_30 = arith.constant dense<0.000000e+00> : vector<8x128xf32>
    %66 = tpu.matmul %63, %65, %cst_30 {dimension_numbers = #tpu.dot_dimension_numbers<[1], [0], [0], [1], [0, 0, 1, 1], [], []>} : vector<8x128xf32>, vector<128x128xf32>, vector<8x128xf32> -> vector<8x128xf32>
    %67 = vector.extract_strided_slice %0 {offsets = [6, 0], sizes = [1, 128], strides = [1, 1]} : vector<7x128xf32> to vector<1x128xf32>
    %68 = vector.shape_cast %67 : vector<1x128xf32> to vector<128xf32>
    %69 = vector.shape_cast %68 : vector<128xf32> to vector<1x128xf32>
    %70 = vector.broadcast %69 : vector<1x128xf32> to vector<8x128xf32>
    %71 = arith.addf %66, %70 : vector<8x128xf32>
    %72 = arith.negf %71 : vector<8x128xf32>
    %73 = math.exp %72 : vector<8x128xf32>
    %cst_31 = arith.constant 1.000000e+00 : f32
    %74 = vector.broadcast %cst_31 : f32 to vector<8x128xf32>
    %75 = arith.addf %74, %73 : vector<8x128xf32>
    %76 = arith.divf %74, %75 : vector<8x128xf32>
    %c0_32 = arith.constant 0 : index
    %c0_33 = arith.constant 0 : index
    %77 = vector.load %arg5[%c0_32, %c0_33] : memref<8x128xf32, #tpu.memory_space<vmem>>, vector<8x128xf32>
    tpu.vector_store %arg5[%c0_32, %c0_33], %76 {strides = array<i32>} : memref<8x128xf32, #tpu.memory_space<vmem>>, vector<8x128xf32>,
    %c0_34 = arith.constant 0 : index
    %c0_35 = arith.constant 0 : index
    %78 = vector.load %arg6[%c0_34, %c0_35] : memref<8x128xf32, #tpu.memory_space<vmem>>, vector<8x128xf32>
    tpu.vector_store %arg6[%c0_34, %c0_35], %29 {strides = array<i32>} : memref<8x128xf32, #tpu.memory_space<vmem>>, vector<8x128xf32>,
    %c0_36 = arith.constant 0 : index
    %c0_37 = arith.constant 0 : index
    %79 = vector.load %arg7[%c0_36, %c0_37] : memref<8x128xf32, #tpu.memory_space<vmem>>, vector<8x128xf32>
    tpu.vector_store %arg7[%c0_36, %c0_37], %37 {strides = array<i32>} : memref<8x128xf32, #tpu.memory_space<vmem>>, vector<8x128xf32>,
    return
  }
  func.func @transform_0(%arg0: i32) -> (i32, i32) {
    %c0_i32 = arith.constant 0 : i32
    %c0_i32_0 = arith.constant 0 : i32
    return %arg0, %c0_i32 : i32, i32
  }
  func.func @transform_1(%arg0: i32) -> (i32, i32) {
    %c0_i32 = arith.constant 0 : i32
    %c0_i32_0 = arith.constant 0 : i32
    return %arg0, %c0_i32 : i32, i32
  }
  func.func @transform_2(%arg0: i32) -> (i32, i32, i32) {
    %c0_i32 = arith.constant 0 : i32
    %c0_i32_0 = arith.constant 0 : i32
    %c0_i32_1 = arith.constant 0 : i32
    %c0_i32_2 = arith.constant 0 : i32
    return %c0_i32, %c0_i32_0, %c0_i32_1 : i32, i32, i32
  }
  func.func @transform_3(%arg0: i32) -> (i32, i32) {
    %c0_i32 = arith.constant 0 : i32
    %c0_i32_0 = arith.constant 0 : i32
    %c0_i32_1 = arith.constant 0 : i32
    return %c0_i32, %c0_i32_0 : i32, i32
  }
  func.func @transform_4(%arg0: i32) -> (i32, i32) {
    %c0_i32 = arith.constant 0 : i32
    %c0_i32_0 = arith.constant 0 : i32
    return %arg0, %c0_i32 : i32, i32
  }
  func.func @transform_5(%arg0: i32) -> (i32, i32) {
    %c0_i32 = arith.constant 0 : i32
    %c0_i32_0 = arith.constant 0 : i32
    return %arg0, %c0_i32 : i32, i32
  }
  func.func @transform_6(%arg0: i32) -> (i32, i32) {
    %c0_i32 = arith.constant 0 : i32
    %c0_i32_0 = arith.constant 0 : i32
    return %arg0, %c0_i32 : i32, i32
  }
}

</mosaic_0001>

<bundles_post_ra>
// kernel: tpu_custom_call.1
= control target key start
LH: loop header
LB: loop body
LE: loop exit
PB: predicated region body
PF: predicated region fallthrough
CT: control target
= control target key end

     0   :  { %12 = vsyncpa [#allocation3], 0  ;;  %s1658_s0 = inlined_call_operand.hbm [shape: f32[8,128], index: 0, kind: input, shape index: {}]   ;;  %s1659_s1 = inlined_call_operand.hbm [shape: f32[8,128], index: 1, kind: input, shape index: {}]   ;;  %s1660_s2 = inlined_call_operand.hbm [shape: f32[7,128,128], index: 2, kind: input, shape index: {}]   ;;  %s1661_s3 = inlined_call_operand.vmem [shape: f32[7,128], index: 3, kind: input, shape index: {}]   ;;  %s1662_s4 = inlined_call_operand.hbm [shape: f32[8,128], index: 4, kind: output, shape index: {0}]   ;;  %s1663_s5 = inlined_call_operand.hbm [shape: f32[8,128], index: 5, kind: output, shape index: {1}]   ;;  %s1664_s6 = inlined_call_operand.hbm [shape: f32[8,128], index: 6, kind: output, shape index: {2}]  }
   0x1   :  { %13 = vsyncpa [#allocation6], 0 }
   0x2   :  { %14 = vsyncpa [#allocation4], 0 }
   0x3   :  { %15 = vsyncpa [#allocation10], 0  ;;  %s1449_s21 = smov [#allocation5]   ;;  %s1450_s23 = smov [#allocation2]  }
   0x4   :  { %s32_s22 = sshll.u32 %s1449_s21, 4  ;;  %s22_s24 = sshll.u32 %s1450_s23, 4  ;;  %s33_s22 = int_to_ptr.vmem [resolvable:$true] %s32_s22  ;;  %s23_s24 = int_to_ptr.vmem [resolvable:$true] %s22_s24 }
   0x5   :  { %s1309_s27 = scalar_lea.hbm %s1659_s1, 128 }
   0x6   :  { %p1310_p0 = scmp.ne.s32.totalorder %s1659_s1, %s1309_s27  ;;  %p1313_p1 = scmp.lt.u32.totalorder %s1309_s27, %s1659_s1 }
   0x8   :  { %p1315_p2 = pnand %p1313_p1, %p1310_p0 }
   0xa   :  { %1318 = shalt.err (!%p1315_p2)
}
   0xb   :  { %s1319_s8 = scalar_lea.vmem %s33_s22, 128  ;;  %p1324_p4 = scmp.lt.s32.totalorder %s33_s22, %s33_s22 }
   0xc   :  { %p1320_p3 = scmp.ne.s32.totalorder %s33_s22, %s1319_s8  ;;  %p1325_p5 = scmp.lt.s32.totalorder %s1319_s8, %s1319_s8 }
   0xe   :  { %p1326_p6 = por %p1325_p5, %p1324_p4 }
  0x10   :  { %p1327_p7 = pnand %p1326_p6, %p1320_p3 }
  0x12   :  { %1330 = shalt.err (!%p1327_p7)
}
  0x13   :  { %35 = dma.hbm_to_vmem [thread:$0]  %s1659_s1, 128, %s33_s22, [#allocation6]  }
  0x14   :  { %s1331_s13 = scalar_lea.hbm %s1658_s0, 128 }
  0x15   :  { %p1332_p8 = scmp.ne.s32.totalorder %s1658_s0, %s1331_s13  ;;  %p1335_p9 = scmp.lt.u32.totalorder %s1331_s13, %s1658_s0 }
  0x17   :  { %p1337_p10 = pnand %p1335_p9, %p1332_p8 }
  0x19   :  { %1340 = shalt.err (!%p1337_p10)
}
  0x1a   :  { %s1341_s18 = scalar_lea.vmem %s23_s24, 128  ;;  %p1346_p12 = scmp.lt.s32.totalorder %s23_s24, %s23_s24 }
  0x1b   :  { %p1342_p11 = scmp.ne.s32.totalorder %s23_s24, %s1341_s18  ;;  %p1347_p13 = scmp.lt.s32.totalorder %s1341_s18, %s1341_s18 }
  0x1d   :  { %p1348_p0 = por %p1347_p13, %p1346_p12 }
  0x1f   :  { %p1349_p1 = pnand %p1348_p0, %p1342_p11 }
  0x21   :  { %1352 = shalt.err (!%p1349_p1)
}
  0x22   :  { %25 = dma.hbm_to_vmem [thread:$0]  %s1658_s0, 128, %s23_s24, [#allocation3]  }
  0x23   :  { %s1451_s20 = smov [#allocation7]   ;;  %s1353_s25 = scalar_lea.hbm %s1660_s2, 14336 }
  0x24   :  { %s41_s21 = sshll.u32 %s1451_s20, 4  ;;  %p1354_p2 = scmp.ne.s32.totalorder %s1660_s2, %s1353_s25  ;;  %s42_s21 = int_to_ptr.vmem [resolvable:$true] %s41_s21 }
  0x25   :  { %p1357_p3 = scmp.lt.u32.totalorder %s1353_s25, %s1660_s2 }
  0x27   :  { %p1359_p4 = pnand %p1357_p3, %p1354_p2 }
  0x29   :  { %1362 = shalt.err (!%p1359_p4)
}
  0x2a   :  { %s1363_s30 = scalar_lea.vmem %s42_s21, 14336  ;;  %p1368_p6 = scmp.lt.s32.totalorder %s42_s21, %s42_s21 }
  0x2b   :  { %p1364_p5 = scmp.ne.s32.totalorder %s42_s21, %s1363_s30  ;;  %p1369_p7 = scmp.lt.s32.totalorder %s1363_s30, %s1363_s30 }
  0x2d   :  { %p1370_p8 = por %p1369_p7, %p1368_p6 }
  0x2f   :  { %p1371_p9 = pnand %p1370_p8, %p1364_p5 }
  0x31   :  { %1374 = shalt.err (!%p1371_p9)
}
  0x32   :  { %s1452_s0 = smov 128   ;;  %s1453_s24 = smov 8  }
  0x33   :  { %47 = dma.hbm_to_vmem [thread:$0]  %s1660_s2, 14336, %s42_s21, [#allocation6], %s1452_s0, %s1452_s0, %s1453_s24  }
  0x34   :  { %1441 = dma.done.wait [#allocation3], 128  }
  0x35   :  { %1442 = vsyncadd [#allocation3], 4294967168 }
  0x36   :  { %1443 = dma.done.wait [#allocation6], 14464  }
  0x37   :  { %1444 = vsyncadd [#allocation6], 4294952832  ;;  %v1454_v0 = vmov 0.0|0.0   ;;  %vm1455_vm0 = vmmov 0   ;;  %v1456_v1 = vmov 0.0   ;;  %v61_v2 = vld [vmem:[#allocation7] sm:$0xff] }
  0x38   :  { %1124 = vmatprep.subr.bf16.mxu0 %v1454_v0  ;;  %911 = vmatprep.mubr.msk.f32.mxu0 %vm1455_vm0, %v1456_v1  ;;  %v62_v3 = vld [vmem:[#allocation7 + $0x8] sm:$0xff]  ;;  %v63_v4 = vld [vmem:[#allocation7 + $0x10] sm:$0xff]  ;;  %v64_v6 = vld [vmem:[#allocation7 + $0x18] sm:$0xff] }
  0x39   :  { %1148 = vmatprep.subr.bf16.mxu1 %v1454_v0  ;;  %946 = vmatprep.mubr.msk.f32.mxu1 %vm1455_vm0, %v1456_v1  ;;  %v1125_v5 = vpack.c.bf16 %v62_v3, %v61_v2  ;;  %v1128_v7 = vpack.c.bf16 %v64_v6, %v63_v4  ;;  %v65_v8 = vld [vmem:[#allocation7 + $0x20] sm:$0xff]  ;;  %v66_v9 = vld [vmem:[#allocation7 + $0x28] sm:$0xff]  ;;  %v155_v12 = vld [vmem:[#allocation7 + $0x90] sm:$0xff] }
  0x3a   :  { %v153_v10 = vld [vmem:[#allocation7 + $0x80] sm:$0xff]  ;;  %v154_v11 = vld [vmem:[#allocation7 + $0x88] sm:$0xff]  ;;  %v156_v13 = vld [vmem:[#allocation7 + $0x98] sm:$0xff]  ;;  %v1131_v14 = vpack.c.bf16 %v66_v9, %v65_v8 }
  0x3b   :  { %1126 = vmatpush3.bf16.msra.mxu0 %v1125_v5  ;;  %v1149_v15 = vpack.c.bf16 %v154_v11, %v153_v10  ;;  %v67_v16 = vld [vmem:[#allocation7 + $0x30] sm:$0xff]  ;;  %v68_v17 = vld [vmem:[#allocation7 + $0x38] sm:$0xff]  ;;  %v1152_v18 = vpack.c.bf16 %v156_v13, %v155_v12  ;;  %v157_v19 = vld [vmem:[#allocation7 + $0xa0] sm:$0xff]  ;;  %v77_v10 = vlaneseq }
  0x3c   :  { %1127 = vmatprep.subr.bf16.mxu0 %v1454_v0  ;;  %v158_v20 = vld [vmem:[#allocation7 + $0xa8] sm:$0xff]  ;;  %v1134_v21 = vpack.c.bf16 %v68_v17, %v67_v16  ;;  %v69_v22 = vld [vmem:[#allocation7 + $0x40] sm:$0xff]  ;;  %v159_v25 = vld [vmem:[#allocation7 + $0xb0] sm:$0xff] }
  0x3d   :  { %1150 = vmatpush3.bf16.msra.mxu1 %v1149_v15  ;;  %v70_v23 = vld [vmem:[#allocation7 + $0x48] sm:$0xff]  ;;  %v1155_v24 = vpack.c.bf16 %v158_v20, %v157_v19  ;;  %v160_v26 = vld [vmem:[#allocation7 + $0xb8] sm:$0xff]  ;;  %v71_v28 = vld [vmem:[#allocation7 + $0x50] sm:$0xff]  ;;  %v1562_v11 = vshrl.u32 %v77_v10, 7 }
  0x3e   :  { %1151 = vmatprep.subr.bf16.mxu1 %v1454_v0  ;;  %v1137_v27 = vpack.c.bf16 %v70_v23, %v69_v22  ;;  %v72_v29 = vld [vmem:[#allocation7 + $0x58] sm:$0xff]  ;;  %v1158_v30 = vpack.c.bf16 %v160_v26, %v159_v25  ;;  %v161_v31 = vld [vmem:[#allocation7 + $0xc0] sm:$0xff]  ;;  %v162_v32 = vld [vmem:[#allocation7 + $0xc8] sm:$0xff] }
  0x3f   :  { %1129 = vmatpush3.bf16.msra.mxu0 %v1128_v7  ;;  %v1140_v33 = vpack.c.bf16 %v72_v29, %v71_v28  ;;  %v73_v34 = vld [vmem:[#allocation7 + $0x60] sm:$0xff]  ;;  %v74_v35 = vld [vmem:[#allocation7 + $0x68] sm:$0xff]  ;;  %v1161_v36 = vpack.c.bf16 %v162_v32, %v161_v31  ;;  %v163_v37 = vld [vmem:[#allocation7 + $0xd0] sm:$0xff]  ;;  %v79_v12 = vsub.s32 0, %v1562_v11 }
  0x40   :  { %1130 = vmatprep.subr.bf16.mxu0 %v1454_v0  ;;  %v164_v38 = vld [vmem:[#allocation7 + $0xd8] sm:$0xff]  ;;  %v1143_v39 = vpack.c.bf16 %v74_v35, %v73_v34  ;;  %v75_v40 = vld [vmem:[#allocation7 + $0x70] sm:$0xff]  ;;  %v165_v43 = vld [vmem:[#allocation7 + $0xe0] sm:$0xff] }
  0x41   :  { %1153 = vmatpush3.bf16.msra.mxu1 %v1152_v18  ;;  %v76_v41 = vld [vmem:[#allocation7 + $0x78] sm:$0xff]  ;;  %v1164_v42 = vpack.c.bf16 %v164_v38, %v163_v37  ;;  %v166_v44 = vld [vmem:[#allocation7 + $0xe8] sm:$0xff]  ;;  %v60_v47 = vld [vmem:[#allocation2] sm:$0xff] }
  0x42   :  { %1154 = vmatprep.subr.bf16.mxu1 %v1454_v0  ;;  %v1146_v45 = vpack.c.bf16 %v76_v41, %v75_v40  ;;  %v1167_v46 = vpack.c.bf16 %v166_v44, %v165_v43  ;;  %v167_v48 = vld [vmem:[#allocation7 + $0xf0] sm:$0xff]  ;;  %v168_v49 = vld [vmem:[#allocation7 + $0xf8] sm:$0xff]  ;;  %v245_v51 = vld [vmem:[#allocation7 + $0x100] sm:$0xff] }
  0x43   :  { %1132 = vmatpush3.bf16.msra.mxu0 %v1131_v14  ;;  %v1170_v50 = vpack.c.bf16 %v168_v49, %v167_v48  ;;  %v246_v52 = vld [vmem:[#allocation7 + $0x108] sm:$0xff]  ;;  %v247_v54 = vld [vmem:[#allocation7 + $0x110] sm:$0xff]  ;;  %v248_v55 = vld [vmem:[#allocation7 + $0x118] sm:$0xff] }
  0x44   :  { %1133 = vmatprep.subr.bf16.mxu0 %v1454_v0  ;;  %v1173_v53 = vpack.c.bf16 %v246_v52, %v245_v51  ;;  %v1176_v56 = vpack.c.bf16 %v248_v55, %v247_v54  ;;  %v249_v57 = vld [vmem:[#allocation7 + $0x120] sm:$0xff]  ;;  %v250_v58 = vld [vmem:[#allocation7 + $0x128] sm:$0xff]  ;;  %v251_v60 = vld [vmem:[#allocation7 + $0x130] sm:$0xff] }
  0x45   :  { %1156 = vmatpush3.bf16.msra.mxu1 %v1155_v24  ;;  %v1179_v59 = vpack.c.bf16 %v250_v58, %v249_v57  ;;  %v252_v61 = vld [vmem:[#allocation7 + $0x138] sm:$0xff]  ;;  %v253_v63 = vld [vmem:[#allocation7 + $0x140] sm:$0xff]  ;;  %v254_v2 = vld [vmem:[#allocation7 + $0x148] sm:$0xff] }
  0x46   :  { %1157 = vmatprep.subr.bf16.mxu1 %v1454_v0  ;;  %v1182_v62 = vpack.c.bf16 %v252_v61, %v251_v60  ;;  %v1185_v3 = vpack.c.bf16 %v254_v2, %v253_v63  ;;  %v255_v4 = vld [vmem:[#allocation7 + $0x150] sm:$0xff]  ;;  %v256_v5 = vld [vmem:[#allocation7 + $0x158] sm:$0xff]  ;;  %v257_v7 = vld [vmem:[#allocation7 + $0x160] sm:$0xff] }
  0x47   :  { %1135 = vmatpush3.bf16.msra.mxu0 %v1134_v21  ;;  %v1188_v6 = vpack.c.bf16 %v256_v5, %v255_v4  ;;  %v258_v8 = vld [vmem:[#allocation7 + $0x168] sm:$0xff]  ;;  %v1568_v13 = vld [vmem:[%s1661_s3] sm:$0x7f]  ;;  %v336_v15 = vld [vmem:[#allocation7 + $0x180] sm:$0xff]  ;;  %s1457_s3 = smov [#allocation9]  }
  0x48   :  { %1136 = vmatprep.subr.bf16.mxu0 %v1454_v0  ;;  %v1191_v9 = vpack.c.bf16 %v258_v8, %v257_v7  ;;  %v80_v14 = vrot.slane %v1568_v13, %v79_v12  ;;  %v337_v16 = vld [vmem:[#allocation7 + $0x188] sm:$0xff]  ;;  %v338_v22 = vld [vmem:[#allocation7 + $0x190] sm:$0xff]  ;;  %v339_v23 = vld [vmem:[#allocation7 + $0x198] sm:$0xff]  ;;  %s732_s10 = sshll.u32 %s1457_s3, 4  ;;  %s733_s10 = int_to_ptr.vmem [resolvable:$true] %s732_s10 }
  0x49   :  { %1159 = vmatpush3.bf16.msra.mxu1 %v1158_v30  ;;  %v1197_v20 = vpack.c.bf16 %v337_v16, %v336_v15  ;;  %v1200_v24 = vpack.c.bf16 %v339_v23, %v338_v22  ;;  %v340_v25 = vld [vmem:[#allocation7 + $0x1a0] sm:$0xff]  ;;  %v341_v26 = vld [vmem:[#allocation7 + $0x1a8] sm:$0xff]  ;;  %v342_v28 = vld [vmem:[#allocation7 + $0x1b0] sm:$0xff]  ;;  %s1375_s11 = scalar_lea.vmem %s733_s10, 128  ;;  %p1380_p11 = scmp.lt.s32.totalorder %s733_s10, %s733_s10 }
  0x4a   :  { %1160 = vmatprep.subr.bf16.mxu1 %v1454_v0  ;;  %v343_v29 = vld [vmem:[#allocation7 + $0x1b8] sm:$0xff]  ;;  %v344_v31 = vld [vmem:[#allocation7 + $0x1c0] sm:$0xff]  ;;  %v345_v32 = vld [vmem:[#allocation7 + $0x1c8] sm:$0xff]  ;;  %p1376_p10 = scmp.ne.s32.totalorder %s733_s10, %s1375_s11  ;;  %p1381_p12 = scmp.lt.s32.totalorder %s1375_s11, %s1375_s11 }
  0x4b   :  { %1138 = vmatpush3.bf16.msra.mxu0 %v1137_v27  ;;  %v1203_v27 = vpack.c.bf16 %v341_v26, %v340_v25  ;;  %v1206_v30 = vpack.c.bf16 %v343_v29, %v342_v28  ;;  %v346_v34 = vld [vmem:[#allocation7 + $0x1d0] sm:$0xff]  ;;  %v347_v35 = vld [vmem:[#allocation7 + $0x1d8] sm:$0xff]  ;;  %v348_v37 = vld [vmem:[#allocation7 + $0x1e0] sm:$0xff] }
  0x4c   :  { %1139 = vmatprep.subr.bf16.mxu0 %v1454_v0  ;;  %v349_v38 = vld [vmem:[#allocation7 + $0x1e8] sm:$0xff]  ;;  %v259_v40 = vld [vmem:[#allocation7 + $0x170] sm:$0xff]  ;;  %v260_v41 = vld [vmem:[#allocation7 + $0x178] sm:$0xff]  ;;  %p1382_p13 = por %p1381_p12, %p1380_p11 }
  0x4d   :  { %1162 = vmatpush3.bf16.msra.mxu1 %v1161_v36  ;;  %v1212_v36 = vpack.c.bf16 %v347_v35, %v346_v34  ;;  %v1194_v43 = vpack.c.bf16 %v260_v41, %v259_v40  ;;  %v351_v44 = vld [vmem:[#allocation7 + $0x1f8] sm:$0xff]  ;;  %v433_v48 = vld [vmem:[#allocation7 + $0x200] sm:$0xff]  ;;  %v434_v49 = vld [vmem:[#allocation7 + $0x208] sm:$0xff] }
  0x4e   :  { %1163 = vmatprep.subr.bf16.mxu1 %v1454_v0  ;;  %v435_v55 = vld [vmem:[#allocation7 + $0x210] sm:$0xff]  ;;  %v437_v58 = vld [vmem:[#allocation7 + $0x220] sm:$0xff]  ;;  %v530_v23 = vld [vmem:[#allocation7 + $0x2a8] sm:$0xff]  ;;  %p1383_p0 = pnand %p1382_p13, %p1376_p10 }
  0x4f   :  { %1141 = vmatpush3.bf16.msra.mxu0 %v1140_v33  ;;  %v1209_v33 = vpack.c.bf16 %v345_v32, %v344_v31  ;;  %v439_v61 = vld [vmem:[#allocation7 + $0x230] sm:$0xff]  ;;  %v441_v2 = vld [vmem:[#allocation7 + $0x240] sm:$0xff]  ;;  %v532_v26 = vld [vmem:[#allocation7 + $0x2b8] sm:$0xff] }
  0x50   :  { %1142 = vmatprep.subr.bf16.mxu0 %v1454_v0  ;;  %v443_v5 = vld [vmem:[#allocation7 + $0x250] sm:$0xff]  ;;  %v445_v8 = vld [vmem:[#allocation7 + $0x260] sm:$0xff]  ;;  %v534_v29 = vld [vmem:[#allocation7 + $0x2c8] sm:$0xff] }
  0x51   :  { %1165 = vmatpush3.bf16.msra.mxu1 %v1164_v42  ;;  %v350_v42 = vld [vmem:[#allocation7 + $0x1f0] sm:$0xff]  ;;  %v525_v16 = vld [vmem:[#allocation7 + $0x280] sm:$0xff]  ;;  %v536_v32 = vld [vmem:[#allocation7 + $0x2d8] sm:$0xff] }
  0x52   :  { %1166 = vmatprep.subr.bf16.mxu1 %v1454_v0  ;;  %v447_v12 = vld [vmem:[#allocation7 + $0x270] sm:$0xff]  ;;  %v529_v22 = vld [vmem:[#allocation7 + $0x2a0] sm:$0xff]  ;;  %v538_v35 = vld [vmem:[#allocation7 + $0x2e8] sm:$0xff] }
  0x53   :  { %1144 = vmatpush3.bf16.msra.mxu0 %v1143_v39  ;;  %v1215_v39 = vpack.c.bf16 %v349_v38, %v348_v37  ;;  %v531_v25 = vld [vmem:[#allocation7 + $0x2b0] sm:$0xff]  ;;  %v533_v28 = vld [vmem:[#allocation7 + $0x2c0] sm:$0xff]  ;;  %v263_v37 = vsub.s32 2, %v1562_v11  ;;  %v354_v38 = vsub.s32 3, %v1562_v11 }
  0x54   :  { %1145 = vmatprep.subr.bf16.mxu0 %v1454_v0  ;;  %v535_v31 = vld [vmem:[#allocation7 + $0x2d0] sm:$0xff]  ;;  %v537_v34 = vld [vmem:[#allocation7 + $0x2e0] sm:$0xff] }
  0x55   :  { %1168 = vmatpush3.bf16.msra.mxu1 %v1167_v46  ;;  %v171_v46 = vsub.s32 1, %v1562_v11  ;;  %v355_v40 = vrot.slane %v1568_v13, %v354_v38 }
  0x56   :  { %1169 = vmatprep.subr.bf16.mxu1 %v1454_v0 }
  0x57   :  { %1147 = vmatpush3.bf16.msra.mxu0 %v1146_v45  ;;  %v1218_v45 = vpack.c.bf16 %v351_v44, %v350_v42 }
  0x58   :  { %1172 = vmatprep.subr.bf16.mxu0 %v1454_v0 }
  0x59   :  { %1171 = vmatpush3.bf16.msra.mxu1 %v1170_v50 }
  0x5a   :  { %912 = vmatmul.mubr.f32.vlgmr.msra.gmra.mrb[0].mxu0 %v60_v47  ;;  %1196 = vmatprep.subr.bf16.mxu1 %v1454_v0  ;;  %v172_v47 = vrot.slane %v1568_v13, %v171_v46 }
  0x5b   :  { %981 = vmatprep.mubr.msk.f32.mxu0 %vm1455_vm0, %v1456_v1  ;;  %1174 = vmatpush3.bf16.msra.mxu0 %v1173_v53  ;;  %v1221_v53 = vpack.c.bf16 %v434_v49, %v433_v48  ;;  %v426_v49 = vld [vmem:[#allocation5] sm:$0xff] }
  0x5c   :  { %1175 = vmatprep.subr.bf16.mxu0 %v1454_v0 }
  0x5f   :  { %1177 = vmatpush3.bf16.msra.mxu0 %v1176_v56  ;;  %v436_v56 = vld [vmem:[#allocation7 + $0x218] sm:$0xff] }
  0x60   :  { %1178 = vmatprep.subr.bf16.mxu0 %v1454_v0  ;;  %v1224_v57 = vpack.c.bf16 %v436_v56, %v435_v55  ;;  %v617_v56 = vld [vmem:[#allocation7 + $0x300] sm:$0xff] }
  0x63   :  { %1180 = vmatpush3.bf16.msra.mxu0 %v1179_v59  ;;  %v438_v59 = vld [vmem:[#allocation7 + $0x228] sm:$0xff] }
  0x64   :  { %1181 = vmatprep.subr.bf16.mxu0 %v1454_v0  ;;  %v1227_v60 = vpack.c.bf16 %v438_v59, %v437_v58  ;;  %v619_v58 = vld [vmem:[#allocation7 + $0x310] sm:$0xff] }
  0x67   :  { %1183 = vmatpush3.bf16.msra.mxu0 %v1182_v62  ;;  %v440_v62 = vld [vmem:[#allocation7 + $0x238] sm:$0xff] }
  0x68   :  { %1184 = vmatprep.subr.bf16.mxu0 %v1454_v0  ;;  %v1230_v63 = vpack.c.bf16 %v440_v62, %v439_v61  ;;  %v621_v62 = vld [vmem:[#allocation7 + $0x320] sm:$0xff] }
  0x6b   :  { %1186 = vmatpush3.bf16.msra.mxu0 %v1185_v3  ;;  %v442_v3 = vld [vmem:[#allocation7 + $0x248] sm:$0xff] }
  0x6c   :  { %1187 = vmatprep.subr.bf16.mxu0 %v1454_v0  ;;  %v1233_v4 = vpack.c.bf16 %v442_v3, %v441_v2  ;;  %v624_v3 = vld [vmem:[#allocation7 + $0x338] sm:$0xff] }
  0x6f   :  { %1189 = vmatpush3.bf16.msra.mxu0 %v1188_v6  ;;  %v444_v6 = vld [vmem:[#allocation7 + $0x258] sm:$0xff] }
  0x70   :  { %1190 = vmatprep.subr.bf16.mxu0 %v1454_v0  ;;  %v1236_v7 = vpack.c.bf16 %v444_v6, %v443_v5  ;;  %v625_v5 = vld [vmem:[#allocation7 + $0x340] sm:$0xff]  ;;  %v626_v6 = vld [vmem:[#allocation7 + $0x348] sm:$0xff] }
  0x73   :  { %1192 = vmatpush3.bf16.msra.mxu0 %v1191_v9  ;;  %v446_v9 = vld [vmem:[#allocation7 + $0x268] sm:$0xff] }
  0x74   :  { %1193 = vmatprep.subr.bf16.mxu0 %v1454_v0  ;;  %v1239_v10 = vpack.c.bf16 %v446_v9, %v445_v8  ;;  %v627_v8 = vld [vmem:[#allocation7 + $0x350] sm:$0xff]  ;;  %v628_v9 = vld [vmem:[#allocation7 + $0x358] sm:$0xff] }
  0x77   :  { %1195 = vmatpush3.bf16.msra.mxu0 %v1194_v43 }
  0x78   :  { %1220 = vmatprep.subr.bf16.mxu0 %v1454_v0 }
 0x12d   :  { %v147_v17 = vpop.f32.mrb[0].mxu0 }
 0x12e   :  { %v148_v18 = vadd.f32 %v147_v17, %v80_v14  ;;  %v913_v19 = vpop.f32.mrb[1].mxu0  ;;  %v448_v14 = vld [vmem:[#allocation7 + $0x278] sm:$0xff]  ;;  %v526_v17 = vld [vmem:[#allocation7 + $0x288] sm:$0xff] }
 0x12f   :  { %v1242_v15 = vpack.c.bf16 %v448_v14, %v447_v12  ;;  %v1245_v19 = vpack.c.bf16 %v526_v17, %v525_v16  ;;  %v629_v12 = vld [vmem:[#allocation7 + $0x360] sm:$0xff]  ;;  %v630_v14 = vld [vmem:[#allocation7 + $0x368] sm:$0xff]  ;;  %v451_v16 = vsub.s32 4, %v1562_v11 }
 0x130   :  { %v151_v21 = vmax.f32 %v148_v18, 0.0  ;;  %v527_v18 = vld [vmem:[#allocation7 + $0x290] sm:$0xff] }
 0x131   :  { %v452_v17 = vrot.slane %v1568_v13, %v451_v16 }
 0x132   :  { %947 = vmatmul.mubr.f32.vlgmr.msra.gmra.mrb[0].mxu1 %v151_v21 }
 0x133   :  { %1198 = vmatpush3.bf16.msra.mxu1 %v1197_v20  ;;  %1016 = vmatprep.mubr.msk.f32.mxu1 %vm1455_vm0, %v1456_v1  ;;  %v528_v20 = vld [vmem:[#allocation7 + $0x298] sm:$0xff] }
 0x134   :  { %1199 = vmatprep.subr.bf16.mxu1 %v1454_v0  ;;  %v1248_v21 = vpack.c.bf16 %v528_v20, %v527_v18 }
 0x137   :  { %1201 = vmatpush3.bf16.msra.mxu1 %v1200_v24  ;;  %v1251_v24 = vpack.c.bf16 %v530_v23, %v529_v22  ;;  %v631_v22 = vld [vmem:[#allocation7 + $0x370] sm:$0xff]  ;;  %v632_v23 = vld [vmem:[#allocation7 + $0x378] sm:$0xff] }
 0x138   :  { %1202 = vmatprep.subr.bf16.mxu1 %v1454_v0 }
 0x13b   :  { %1204 = vmatpush3.bf16.msra.mxu1 %v1203_v27  ;;  %v1254_v27 = vpack.c.bf16 %v532_v26, %v531_v25  ;;  %v543_v25 = vsub.s32 5, %v1562_v11 }
 0x13c   :  { %1205 = vmatprep.subr.bf16.mxu1 %v1454_v0 }
 0x13d   :  { %v544_v26 = vrot.slane %v1568_v13, %v543_v25 }
 0x13f   :  { %1207 = vmatpush3.bf16.msra.mxu1 %v1206_v30  ;;  %v1257_v30 = vpack.c.bf16 %v534_v29, %v533_v28 }
 0x140   :  { %1208 = vmatprep.subr.bf16.mxu1 %v1454_v0 }
 0x143   :  { %1210 = vmatpush3.bf16.msra.mxu1 %v1209_v33  ;;  %v1260_v33 = vpack.c.bf16 %v536_v32, %v535_v31 }
 0x144   :  { %1211 = vmatprep.subr.bf16.mxu1 %v1454_v0 }
 0x147   :  { %1213 = vmatpush3.bf16.msra.mxu1 %v1212_v36  ;;  %v1263_v36 = vpack.c.bf16 %v538_v35, %v537_v34 }
 0x148   :  { %1214 = vmatprep.subr.bf16.mxu1 %v1454_v0 }
 0x14b   :  { %1216 = vmatpush3.bf16.msra.mxu1 %v1215_v39  ;;  %v264_v39 = vrot.slane %v1568_v13, %v263_v37 }
 0x14c   :  { %1217 = vmatprep.subr.bf16.mxu1 %v1454_v0 }
 0x14f   :  { %1219 = vmatpush3.bf16.msra.mxu1 %v1218_v45 }
 0x150   :  { %1244 = vmatprep.subr.bf16.mxu1 %v1454_v0 }
 0x205   :  { %v239_v50 = vpop.f32.mrb[0].mxu1 }
 0x206   :  { %v240_v51 = vadd.f32 %v239_v50, %v172_v47  ;;  %v948_v52 = vpop.f32.mrb[1].mxu1 }
 0x208   :  { %v243_v54 = vmax.f32 %v240_v51, 0.0 }
 0x20a   :  { %982 = vmatmul.mubr.f32.vlgmr.msra.gmra.mrb[2].mxu0 %v243_v54  ;;  %1017 = vmatmul.mubr.f32.vlgmr.msra.gmra.mrb[2].mxu1 %v243_v54  ;;  %v540_v54 = vld [vmem:[#allocation7 + $0x2f8] sm:$0xff] }
 0x20b   :  { %1222 = vmatpush3.bf16.msra.mxu0 %v1221_v53  ;;  %1051 = vmatprep.mubr.msk.f32.mxu0 %vm1455_vm0, %v1456_v1  ;;  %v539_v53 = vld [vmem:[#allocation7 + $0x2f0] sm:$0xff] }
 0x20c   :  { %1223 = vmatprep.subr.bf16.mxu0 %v1454_v0  ;;  %1086 = vmatprep.mubr.msk.f32.mxu1 %vm1455_vm0, %v1456_v1  ;;  %v1266_v55 = vpack.c.bf16 %v540_v54, %v539_v53 }
 0x20d   :  { %1246 = vmatpush3.bf16.msra.mxu1 %v1245_v19 }
 0x20e   :  { %1247 = vmatprep.subr.bf16.mxu1 %v1454_v0 }
 0x20f   :  { %1225 = vmatpush3.bf16.msra.mxu0 %v1224_v57  ;;  %v618_v57 = vld [vmem:[#allocation7 + $0x308] sm:$0xff] }
 0x210   :  { %1226 = vmatprep.subr.bf16.mxu0 %v1454_v0  ;;  %v1269_v59 = vpack.c.bf16 %v618_v57, %v617_v56 }
 0x211   :  { %1249 = vmatpush3.bf16.msra.mxu1 %v1248_v21 }
 0x212   :  { %1250 = vmatprep.subr.bf16.mxu1 %v1454_v0 }
 0x213   :  { %1228 = vmatpush3.bf16.msra.mxu0 %v1227_v60  ;;  %v620_v60 = vld [vmem:[#allocation7 + $0x318] sm:$0xff] }
 0x214   :  { %1229 = vmatprep.subr.bf16.mxu0 %v1454_v0  ;;  %v1272_v61 = vpack.c.bf16 %v620_v60, %v619_v58 }
 0x215   :  { %1252 = vmatpush3.bf16.msra.mxu1 %v1251_v24  ;;  %v1290_v24 = vpack.c.bf16 %v632_v23, %v631_v22 }
 0x216   :  { %1253 = vmatprep.subr.bf16.mxu1 %v1454_v0 }
 0x217   :  { %1231 = vmatpush3.bf16.msra.mxu0 %v1230_v63  ;;  %v622_v63 = vld [vmem:[#allocation7 + $0x328] sm:$0xff] }
 0x218   :  { %1232 = vmatprep.subr.bf16.mxu0 %v1454_v0  ;;  %v1275_v2 = vpack.c.bf16 %v622_v63, %v621_v62 }
 0x219   :  { %1255 = vmatpush3.bf16.msra.mxu1 %v1254_v27 }
 0x21a   :  { %1256 = vmatprep.subr.bf16.mxu1 %v1454_v0 }
 0x21b   :  { %1234 = vmatpush3.bf16.msra.mxu0 %v1233_v4 }
 0x21c   :  { %1235 = vmatprep.subr.bf16.mxu0 %v1454_v0 }
 0x21d   :  { %1258 = vmatpush3.bf16.msra.mxu1 %v1257_v30 }
 0x21e   :  { %1259 = vmatprep.subr.bf16.mxu1 %v1454_v0 }
 0x21f   :  { %1237 = vmatpush3.bf16.msra.mxu0 %v1236_v7  ;;  %v1281_v7 = vpack.c.bf16 %v626_v6, %v625_v5 }
 0x220   :  { %1238 = vmatprep.subr.bf16.mxu0 %v1454_v0 }
 0x221   :  { %1261 = vmatpush3.bf16.msra.mxu1 %v1260_v33 }
 0x222   :  { %1262 = vmatprep.subr.bf16.mxu1 %v1454_v0 }
 0x223   :  { %1240 = vmatpush3.bf16.msra.mxu0 %v1239_v10  ;;  %v1284_v10 = vpack.c.bf16 %v628_v9, %v627_v8 }
 0x224   :  { %1241 = vmatprep.subr.bf16.mxu0 %v1454_v0 }
 0x225   :  { %1264 = vmatpush3.bf16.msra.mxu1 %v1263_v36 }
 0x226   :  { %1265 = vmatprep.subr.bf16.mxu1 %v1454_v0 }
 0x227   :  { %1243 = vmatpush3.bf16.msra.mxu0 %v1242_v15  ;;  %v1287_v15 = vpack.c.bf16 %v630_v14, %v629_v12 }
 0x228   :  { %1268 = vmatprep.subr.bf16.mxu0 %v1454_v0 }
 0x229   :  { %1267 = vmatpush3.bf16.msra.mxu1 %v1266_v55 }
 0x2dd   :  { %v331_v41 = vpop.f32.mrb[2].mxu0  ;;  %v422_v42 = vpop.f32.mrb[2].mxu1 }
 0x2de   :  { %v332_v43 = vadd.f32 %v331_v41, %v264_v39  ;;  %v423_v44 = vadd.f32 %v422_v42, %v355_v40  ;;  %v983_v45 = vpop.f32.mrb[3].mxu0  ;;  %v1018_v46 = vpop.f32.mrb[3].mxu1 }
 0x2e0   :  { %714 = vst [vmem:[#allocation9] sm:$0xff] %v332_v43  ;;  %v427_v47 = vmul.f32 0.5, %v423_v44  ;;  %715 = vst [vmem:[#allocation11] sm:$0xff] %v423_v44 }
 0x2e2   :  { %v428_v48 = vmul.f32 1.442695, %v427_v47 }
 0x2e4   :  { %1303 = vpow2.f32 %v428_v48 }
 0x2ee   :  { %v1304_v50 = vpop.eup %1303 }
 0x2ef   :  { %v430_v51 = vmul.f32 %v1304_v50, %v426_v49 }
 0x2f1   :  { %v431_v52 = vadd.f32 %v430_v51, %v332_v43 }
 0x2f3   :  { %1052 = vmatmul.mubr.f32.vlgmr.msra.gmra.mrb[4].mxu0 %v431_v52 }
 0x2f4   :  { %1121 = vmatprep.mubr.msk.f32.mxu0 %vm1455_vm0, %v1456_v1  ;;  %1270 = vmatpush3.bf16.msra.mxu0 %v1269_v59  ;;  %v623_v1 = vld [vmem:[#allocation7 + $0x330] sm:$0xff] }
 0x2f5   :  { %1271 = vmatprep.subr.bf16.mxu0 %v1454_v0  ;;  %v1278_v4 = vpack.c.bf16 %v624_v3, %v623_v1 }
 0x2f8   :  { %1273 = vmatpush3.bf16.msra.mxu0 %v1272_v61 }
 0x2f9   :  { %1274 = vmatprep.subr.bf16.mxu0 %v1454_v0 }
 0x2fc   :  { %1276 = vmatpush3.bf16.msra.mxu0 %v1275_v2 }
 0x2fd   :  { %1277 = vmatprep.subr.bf16.mxu0 %v1454_v0 }
 0x300   :  { %1279 = vmatpush3.bf16.msra.mxu0 %v1278_v4 }
 0x301   :  { %1280 = vmatprep.subr.bf16.mxu0 %v1454_v0 }
 0x304   :  { %1282 = vmatpush3.bf16.msra.mxu0 %v1281_v7 }
 0x305   :  { %1283 = vmatprep.subr.bf16.mxu0 %v1454_v0 }
 0x308   :  { %1285 = vmatpush3.bf16.msra.mxu0 %v1284_v10 }
 0x309   :  { %1286 = vmatprep.subr.bf16.mxu0 %v1454_v0 }
 0x30c   :  { %1288 = vmatpush3.bf16.msra.mxu0 %v1287_v15 }
 0x30d   :  { %1289 = vmatprep.subr.bf16.mxu0 %v1454_v0 }
 0x310   :  { %1291 = vmatpush3.bf16.msra.mxu0 %v1290_v24 }
 0x3c6   :  { %v519_v18 = vpop.f32.mrb[4].mxu0 }
 0x3c7   :  { %v520_v19 = vadd.f32 %v519_v18, %v452_v17  ;;  %v1053_v20 = vpop.f32.mrb[5].mxu0 }
 0x3c9   :  { %v523_v21 = vmax.f32 %v520_v19, 0.0 }
 0x3cb   :  { %1087 = vmatmul.mubr.f32.vlgmr.msra.gmra.mrb[4].mxu1 %v523_v21 }
 0x49e   :  { %v611_v27 = vpop.f32.mrb[4].mxu1 }
 0x49f   :  { %v612_v28 = vadd.f32 %v611_v27, %v544_v26  ;;  %v1088_v0 = vpop.f32.mrb[5].mxu1 }
 0x4a1   :  { %v615_v29 = vmax.f32 %v612_v28, 0.0 }
 0x4a3   :  { %1122 = vmatmul.mubr.f32.vlgmr.msra.gmra.mrb[6].mxu0 %v615_v29 }
 0x4a4   :  { %1386 = shalt.err (!%p1383_p0)
}
 0x4a5   :  { %s1387_s14 = scalar_lea.hbm %s1663_s5, 128 }
 0x4a6   :  { %p1388_p1 = scmp.ne.s32.totalorder %s1663_s5, %s1387_s14  ;;  %p1391_p2 = scmp.lt.u32.totalorder %s1387_s14, %s1663_s5 }
 0x4a8   :  { %p1393_p3 = pnand %p1391_p2, %p1388_p1 }
 0x4aa   :  { %1396 = shalt.err (!%p1393_p3)
}
 0x4ab   :  { %735 = dma.vmem_to_hbm [thread:$0]  %s733_s10, 128, %s1663_s5, [#allocation10]  }
 0x4ac   :  { %s1458_s20 = smov [#allocation11]  }
 0x4ad   :  { %s742_s21 = sshll.u32 %s1458_s20, 4  ;;  %s743_s21 = int_to_ptr.vmem [resolvable:$true] %s742_s21 }
 0x4ae   :  { %s1397_s22 = scalar_lea.vmem %s743_s21, 128  ;;  %p1402_p5 = scmp.lt.s32.totalorder %s743_s21, %s743_s21 }
 0x4af   :  { %p1398_p4 = scmp.ne.s32.totalorder %s743_s21, %s1397_s22  ;;  %p1403_p6 = scmp.lt.s32.totalorder %s1397_s22, %s1397_s22 }
 0x4b1   :  { %p1404_p7 = por %p1403_p6, %p1402_p5 }
 0x4b3   :  { %p1405_p8 = pnand %p1404_p7, %p1398_p4 }
 0x4b5   :  { %1408 = shalt.err (!%p1405_p8)
}
 0x4b6   :  { %s1409_s26 = scalar_lea.hbm %s1664_s6, 128 }
 0x4b7   :  { %p1410_p9 = scmp.ne.s32.totalorder %s1664_s6, %s1409_s26  ;;  %p1413_p10 = scmp.lt.u32.totalorder %s1409_s26, %s1664_s6 }
 0x4b9   :  { %p1415_p11 = pnand %p1413_p10, %p1410_p9 }
 0x4bb   :  { %1418 = shalt.err (!%p1415_p11)
}
 0x4bc   :  { %745 = dma.vmem_to_hbm [thread:$0]  %s743_s21, 128, %s1664_s6, [#allocation10]   ;;  %v635_v30 = vsub.s32 6, %v1562_v11 }
 0x4bd   :  { %s1459_s24 = smov [#allocation8]  }
 0x4be   :  { %v636_v31 = vrot.slane %v1568_v13, %v635_v30  ;;  %s722_s7 = sshll.u32 %s1459_s24, 4  ;;  %s723_s7 = int_to_ptr.vmem [resolvable:$true] %s722_s7 }
 0x4bf   :  { %s1419_s8 = scalar_lea.vmem %s723_s7, 128  ;;  %p1424_p13 = scmp.lt.s32.totalorder %s723_s7, %s723_s7 }
 0x4c0   :  { %p1420_p12 = scmp.ne.s32.totalorder %s723_s7, %s1419_s8  ;;  %p1425_p0 = scmp.lt.s32.totalorder %s1419_s8, %s1419_s8 }
 0x4c2   :  { %p1426_p1 = por %p1425_p0, %p1424_p13 }
 0x4c4   :  { %p1427_p2 = pnand %p1426_p1, %p1420_p12 }
 0x576   :  { %v703_v32 = vpop.f32.mrb[6].mxu0 }
 0x577   :  { %v704_v33 = vadd.f32 %v703_v32, %v636_v31  ;;  %v1123_v34 = vpop.f32.mrb[7].mxu0 }
 0x579   :  { %v759_v35 = vmul.f32 -1.442695, %v704_v33 }
 0x57b   :  { %1305 = vpow2.f32 %v759_v35 }
 0x585   :  { %v1306_v36 = vpop.eup %1305 }
 0x586   :  { %v710_v37 = vadd.f32 1.0, %v1306_v36 }
 0x588   :  { %1307 = vrcp.f32 %v710_v37 }
 0x592   :  { %v1308_v38 = vpop.eup %1307 }
 0x593   :  { %713 = vst [vmem:[#allocation8] sm:$0xff] %v1308_v38 }
 0x594   :  { %1430 = shalt.err (!%p1427_p2)
}
 0x595   :  { %s1431_s9 = scalar_lea.hbm %s1662_s4, 128 }
 0x596   :  { %p1432_p3 = scmp.ne.s32.totalorder %s1662_s4, %s1431_s9  ;;  %p1435_p4 = scmp.lt.u32.totalorder %s1431_s9, %s1662_s4 }
 0x598   :  { %p1437_p5 = pnand %p1435_p4, %p1432_p3 }
 0x59a   :  { %1440 = shalt.err (!%p1437_p5)
}
 0x59b   :  { %725 = dma.vmem_to_hbm [thread:$0]  %s723_s7, 128, %s1662_s4, [#allocation4]  }
 0x59c   :  { %1445 = dma.done.wait [#allocation4], 128  }
 0x59d   :  { %1446 = vsyncadd [#allocation4], 4294967168 }
 0x59e   :  { %1447 = dma.done.wait [#allocation10], 256  }
 0x59f   :  { %1448 = vsyncadd [#allocation10], 4294967040 }
 0x5a0   :  { %755 = vsyncpa [#allocation3], 1 }
 0x5a1   :  { %756 = vsyncpa [#allocation6], 1 }
 0x5a2   :  { %757 = vsyncpa [#allocation4], 1 }
 0x5a3   :  { %758 = vsyncpa [#allocation10], 1 }

</bundles_post_ra>
